<compile_context>
chip_gen: v5e
topology: v5e:2x2
jax: 0.10.0
libtpu: 0.0.40
codegen_flags: <defaults>
</compile_context>

<pallas_src>
import jax
import jax.numpy as jnp
from jax import lax
from jax.experimental import pallas as pl
from jax.experimental.pallas import tpu as pltpu


def _adain_kernel_factory(eps, hw_true, hw_pad):
    need_mask = hw_pad != hw_true
    inv_n = 1.0 / float(hw_true)

    def adain_kernel(x_ref, wb_ref, o_ref):
        # x_ref: (blk_rows, hw_pad)   wb_ref: (blk_rows, 2) f32 [weight | bias]
        x = x_ref[...].astype(jnp.float32)

        if need_mask:
            lane = lax.broadcasted_iota(jnp.int32, x.shape, dimension=1)
            valid = lane < hw_true
            xs = jnp.where(valid, x, 0.0)
        else:
            xs = x

        # Two-pass (centered) biased variance: numerically robust.
        mean = jnp.sum(xs, axis=-1, keepdims=True) * inv_n
        centered = xs - mean
        if need_mask:
            centered = jnp.where(valid, centered, 0.0)
        var = jnp.sum(centered * centered, axis=-1, keepdims=True) * inv_n
        inv_std = lax.rsqrt(var + eps)

        # Fused affine: out = x * a + c  (2 VALU ops per element).
        w = wb_ref[:, 0:1]
        b = wb_ref[:, 1:2]
        a = w * inv_std
        c = b - mean * a
        o_ref[...] = (x * a + c).astype(o_ref.dtype)

    return adain_kernel


def _pick_blk_rows(bc, hw_pad, itemsize):
    """Largest multiple-of-8 row block fitting ~2 MiB per in/out block."""
    # Budget against the f32 working copy (the wider of io dtype / f32).
    row_bytes = hw_pad * max(int(itemsize), 4)
    target_block_bytes = 2 * 1024 * 1024
    blk = max(8, (target_block_bytes // row_bytes) // 8 * 8)
    # No bigger than (8-padded) BC.
    blk = min(blk, -(-bc // 8) * 8)
    # Keep >= 2 grid steps when possible so both v7x TensorCores get work.
    if bc >= 16:
        half = (((bc + 1) // 2) + 7) // 8 * 8
        blk = min(blk, half)
    return blk


def adaptive_instance_norm_2d(x, weight, bias, eps=1e-5):
    """AdaIN forward.

    Args:
      x:      (B, C, H, W) array.
      weight: (B*C,) dynamically assigned scale.
      bias:   (B*C,) dynamically assigned shift.
      eps:    numerical-stability constant.

    Returns:
      (B, C, H, W) normalized array, same dtype as x.
    """
    B, C, H, W = x.shape
    BC = B * C
    HW = H * W

    x2d = x.reshape(BC, HW)

    # Pad the spatial axis to a multiple of 128 for lane-dense loads/stores.
    HW_pad = -(-HW // 128) * 128
    if HW_pad != HW:
        x2d = jnp.pad(x2d, ((0, 0), (0, HW_pad - HW)))

    # Pack weight/bias into a single (BC, 2) operand -> one small DMA per step.
    wb = jnp.stack(
        [weight.reshape(BC).astype(jnp.float32),
         bias.reshape(BC).astype(jnp.float32)],
        axis=-1,
    )

    itemsize = jnp.dtype(x.dtype).itemsize
    blk_rows = _pick_blk_rows(BC, HW_pad, itemsize)
    grid = (pl.cdiv(BC, blk_rows),)

    # 32 MiB scoped VMEM: >= default on every generation and < v7x's 64 MiB
    # physical ceiling; plenty for double-buffered ~2 MiB blocks + f32 temps.
    vmem_limit = 32 * 1024 * 1024
    # TODO(synk): for very large HW (e.g. >=512x512 f32 rows) switch to a
    # two-pass accumulator layout over HW chunks instead of 8-row blocks.

    out2d = pl.pallas_call(
        _adain_kernel_factory(eps, HW, HW_pad),
        out_shape=jax.ShapeDtypeStruct((BC, HW_pad), x.dtype),
        grid_spec=pltpu.PrefetchScalarGridSpec(
            num_scalar_prefetch=0,
            grid=grid,
            in_specs=[
                pl.BlockSpec((blk_rows, HW_pad), lambda i: (i, 0)),
                pl.BlockSpec((blk_rows, 2), lambda i: (i, 0)),
            ],
            out_specs=pl.BlockSpec((blk_rows, HW_pad), lambda i: (i, 0)),
        ),
        compiler_params=pltpu.CompilerParams(
            dimension_semantics=("parallel",),
            vmem_limit_bytes=vmem_limit,
        ),
    )(x2d, wb)

    if HW_pad != HW:
        out2d = out2d[:, :HW]
    return out2d.reshape(B, C, H, W)


def _reference_adain(x, weight, bias, eps=1e-5):
    B, C, H, W = x.shape
    xf = x.reshape(B * C, H * W).astype(jnp.float32)
    mean = jnp.mean(xf, axis=-1, keepdims=True)
    var = jnp.mean((xf - mean) ** 2, axis=-1, keepdims=True)
    out = weight[:, None] * (xf - mean) / jnp.sqrt(var + eps) + bias[:, None]
    return out.reshape(B, C, H, W).astype(x.dtype)


if __name__ == "__main__":
    B, C, H, W = 2, 4, 16, 16
    eps = 1e-5

    key = jax.random.PRNGKey(0)
    kx, kw, kb = jax.random.split(key, 3)

    x = jax.random.normal(kx, (B, C, H, W), dtype=jnp.float32)
    # In the real model these are assigned from a style code before forward;
    # here we initialize them deterministically with the correct shape (B*C,).
    weight = jax.random.normal(kw, (B * C,), dtype=jnp.float32) * 0.5 + 1.0
    bias = jax.random.normal(kb, (B * C,), dtype=jnp.float32) * 0.1
    # TODO(synk): running_mean/running_var buffer updates (momentum) are
    # side-effect-only in training mode and are not materialized here.

    out = adaptive_instance_norm_2d(x, weight, bias, eps=eps)
    out = jax.block_until_ready(out)

    ref = _reference_adain(x, weight, bias, eps=eps)
    assert out.shape == (B, C, H, W)
    assert jnp.allclose(out, ref, atol=1e-4, rtol=1e-4), "mismatch vs reference"

    print("KERNEL_OK")
</pallas_src>

<mosaic_0001>
module attributes {stable_mosaic.version = 11 : i64} {
  func.func @adain_kernel(%arg0: i32, %arg1: memref<8x256xf32, #tpu.memory_space<vmem>>, %arg2: memref<8x2xf32, #tpu.memory_space<vmem>>, %arg3: memref<8x256xf32, #tpu.memory_space<vmem>>) attributes {dimension_semantics = [#tpu.dimension_semantics<parallel>], iteration_bounds = array<i64: 1>, scalar_prefetch = 0 : i64, scratch_operands = 0 : i64, tpu.core_type = #tpu.core_type<tc>, window_params = [{transform_indices = @transform_0, window_bounds = array<i64: 8, 256>}, {transform_indices = @transform_1, window_bounds = array<i64: 8, 2>}, {transform_indices = @transform_2, window_bounds = array<i64: 8, 256>}]} {
    %c0 = arith.constant 0 : index
    %c0_0 = arith.constant 0 : index
    %0 = vector.load %arg1[%c0, %c0_0] : memref<8x256xf32, #tpu.memory_space<vmem>>, vector<8x256xf32>
    %cst = arith.constant dense<0.000000e+00> : vector<8xf32>
    %1 = vector.multi_reduction <add>, %0, %cst [1] : vector<8x256xf32> to vector<8xf32>
    %2 = vector.shape_cast %1 : vector<8xf32> to vector<8x1xf32>
    %cst_1 = arith.constant 3.906250e-03 : f32
    %3 = vector.broadcast %cst_1 : f32 to vector<8x1xf32>
    %4 = arith.mulf %2, %3 : vector<8x1xf32>
    %5 = vector.broadcast %4 : vector<8x1xf32> to vector<8x256xf32>
    %6 = arith.subf %0, %5 : vector<8x256xf32>
    %7 = arith.mulf %6, %6 : vector<8x256xf32>
    %cst_2 = arith.constant dense<0.000000e+00> : vector<8xf32>
    %8 = vector.multi_reduction <add>, %7, %cst_2 [1] : vector<8x256xf32> to vector<8xf32>
    %9 = vector.shape_cast %8 : vector<8xf32> to vector<8x1xf32>
    %cst_3 = arith.constant 3.906250e-03 : f32
    %10 = vector.broadcast %cst_3 : f32 to vector<8x1xf32>
    %11 = arith.mulf %9, %10 : vector<8x1xf32>
    %cst_4 = arith.constant 9.99999974E-6 : f32
    %12 = vector.broadcast %cst_4 : f32 to vector<8x1xf32>
    %13 = arith.addf %11, %12 : vector<8x1xf32>
    %14 = math.rsqrt %13 : vector<8x1xf32>
    %c0_5 = arith.constant 0 : index
    %c0_6 = arith.constant 0 : index
    %15 = vector.load %arg2[%c0_5, %c0_6] : memref<8x2xf32, #tpu.memory_space<vmem>>, vector<8x1xf32>
    %c0_7 = arith.constant 0 : index
    %c1 = arith.constant 1 : index
    %16 = vector.load %arg2[%c0_7, %c1] : memref<8x2xf32, #tpu.memory_space<vmem>>, vector<8x1xf32>
    %17 = arith.mulf %15, %14 : vector<8x1xf32>
    %18 = arith.mulf %4, %17 : vector<8x1xf32>
    %19 = arith.subf %16, %18 : vector<8x1xf32>
    %20 = vector.broadcast %17 : vector<8x1xf32> to vector<8x256xf32>
    %21 = arith.mulf %0, %20 : vector<8x256xf32>
    %22 = vector.broadcast %19 : vector<8x1xf32> to vector<8x256xf32>
    %23 = arith.addf %21, %22 : vector<8x256xf32>
    %c0_8 = arith.constant 0 : index
    %c0_9 = arith.constant 0 : index
    %24 = vector.load %arg3[%c0_8, %c0_9] : memref<8x256xf32, #tpu.memory_space<vmem>>, vector<8x256xf32>
    tpu.vector_store %arg3[%c0_8, %c0_9], %23 {strides = array<i32>} : memref<8x256xf32, #tpu.memory_space<vmem>>, vector<8x256xf32>,
    return
  }
  func.func @transform_0(%arg0: i32) -> (i32, i32) {
    %c0_i32 = arith.constant 0 : i32
    %c0_i32_0 = arith.constant 0 : i32
    return %arg0, %c0_i32 : i32, i32
  }
  func.func @transform_1(%arg0: i32) -> (i32, i32) {
    %c0_i32 = arith.constant 0 : i32
    %c0_i32_0 = arith.constant 0 : i32
    return %arg0, %c0_i32 : i32, i32
  }
  func.func @transform_2(%arg0: i32) -> (i32, i32) {
    %c0_i32 = arith.constant 0 : i32
    %c0_i32_0 = arith.constant 0 : i32
    return %arg0, %c0_i32 : i32, i32
  }
}

</mosaic_0001>

<bundles_post_ra>
// kernel: tpu_custom_call.1
= control target key start
LH: loop header
LB: loop body
LE: loop exit
PB: predicated region body
PF: predicated region fallthrough
CT: control target
= control target key end

     0   :  { %7 = vsyncpa [#allocation3], 0  ;;  %s183_s0 = inlined_call_operand.hbm [shape: f32[8,256], index: 0, kind: input, shape index: {}]   ;;  %s184_s1 = inlined_call_operand.vmem [shape: f32[8,2], index: 1, kind: input, shape index: {}]   ;;  %s185_s2 = inlined_call_operand.hbm [shape: f32[8,256], index: 2, kind: output, shape index: {}]  }
   0x1   :  { %8 = vsyncpa [#allocation4], 0  ;;  %s14_s11 = sshll.u32 %s183_s0, 4  ;;  %s154_s12 = smov [#allocation2]   ;;  %s15_s11 = int_to_ptr.hbm [resolvable:$true] %s14_s11 }
   0x2   :  { %s16_s13 = sshll.u32 %s154_s12, 4  ;;  %s17_s13 = int_to_ptr.vmem [resolvable:$true] %s16_s13 }
   0x3   :  { %19 = dma.hbm_to_vmem [thread:$0]  %s15_s11, 256, %s17_s13, [#allocation3]  }
   0x4   :  { %150 = dma.done.wait [#allocation3], 256  }
   0x5   :  { %151 = vsyncadd [#allocation3], 4294967040  ;;  %v26_v0 = vld [vmem:[#allocation2] sm:$0xff]  ;;  %v27_v1 = vld [vmem:[#allocation2 + $0x8] sm:$0xff]  ;;  %v155_v10 = vmov 0   ;;  %s156_s15 = smov 1  }
   0x6   :  { %v28_v2 = vadd.f32 %v27_v1, %v26_v0  ;;  %97 = vset.pattern.permute.xlu1 %v155_v10  ;;  %v51_v20 = vld [vmem:[%s184_s1] sm:$0xff]  ;;  %v157_v24 = vmov 1   ;;  %s158_s16 = smov [#allocation5]   ;;  %s82_s19 = sshll.u32 %s185_s2, 4  ;;  %s83_s19 = int_to_ptr.hbm [resolvable:$true] %s82_s19 }
   0x7   :  { %98 = vset.pattern.permute.xlu2 %v157_v24  ;;  %99 = vset.pattern.permute.xlu0 %v157_v24  ;;  %s80_s17 = sshll.u32 %s158_s16, 4  ;;  %s81_s17 = int_to_ptr.vmem [resolvable:$true] %s80_s17 }
   0x8   :  { %29 = vadd.xlane.f32.xlu0 %v28_v2 }
  0x7b   :  { %v30_v3 = vpop.xlane.xlu0 %29 }
  0x7c   :  { %v31_v4 = vmul.f32 0.00390625, %v30_v3 }
  0x7e   :  { %v32_v5 = vsub.f32 %v26_v0, %v31_v4  ;;  %v33_v6 = vsub.f32 %v27_v1, %v31_v4 }
  0x80   :  { %v34_v7 = vmul.f32 %v32_v5, %v32_v5  ;;  %v35_v8 = vmul.f32 %v33_v6, %v33_v6 }
  0x82   :  { %v36_v9 = vadd.f32 %v35_v8, %v34_v7 }
  0x84   :  { %37 = vadd.xlane.f32.xlu0 %v36_v9 }
  0xf7   :  { %v38_v11 = vpop.xlane.xlu0 %37 }
  0xf8   :  { %v39_v12 = vmul.f32 0.00390625, %v38_v11 }
  0xfa   :  { %v40_v13 = vadd.f32 1e-05, %v39_v12 }
  0xfc   :  { %100 = vrsqrt.f32 %v40_v13  ;;  %vm47_vm1 = vweird.f32 %v40_v13 }
 0x102   :  { %v101_v14 = vpop.eup %100 }
 0x103   :  { %v42_v15 = vmul.f32 %v101_v14, %v40_v13  ;;  %vm48_vm0 = vweird.f32 %v101_v14 }
 0x104   :  { %vm49_vm2 = vmor %vm47_vm1, %vm48_vm0 }
 0x105   :  { %v43_v16 = vmul.f32 %v101_v14, %v42_v15 }
 0x107   :  { %v44_v17 = vmul.f32 0.5, %v43_v16 }
 0x109   :  { %v45_v18 = vsub.f32 1.5, %v44_v17 }
 0x10b   :  { %v46_v19 = vmul.f32 %v101_v14, %v45_v18 }
 0x10d   :  { %v50_v21 = vsel %vm49_vm2, %v101_v14, %v46_v19 }
 0x10e   :  { %v52_v22 = vmul.f32 %v51_v20, %v50_v21 }
 0x110   :  { %v53_v23 = vmul.f32 %v52_v22, %v31_v4 }
 0x112   :  { %55 = vrot.lane.b32.xlu1 %v53_v23, %s156_s15 }
 0x11a   :  { %61 = vperm.xlu1 %97, %v52_v22  }
 0x184   :  { %v56_v25 = vpop.permute.xlu1 %55 }
 0x185   :  { %v58_v26 = vsub.f32 %v51_v20, %v56_v25 }
 0x187   :  { %68 = vperm.xlu2 %98, %v58_v26  }
 0x18c   :  { %v62_v27 = vpop.permute.xlu1 %61 }
 0x18d   :  { %v64_v28 = vmul.f32 %v62_v27, %v26_v0  ;;  %v65_v29 = vmul.f32 %v62_v27, %v27_v1 }
 0x1e1   :  { %v69_v30 = vpop.permute.xlu2 %68 }
 0x1e2   :  { %v71_v31 = vadd.f32 %v69_v30, %v64_v28  ;;  %v72_v32 = vadd.f32 %v69_v30, %v65_v29 }
 0x1e4   :  { %73 = vst [vmem:[#allocation5] sm:$0xff] %v71_v31 }
 0x1e5   :  { %74 = vst [vmem:[#allocation5 + $0x8] sm:$0xff] %v72_v32 }
 0x1e6   :  { %85 = dma.vmem_to_hbm [thread:$0]  %s81_s17, 256, %s83_s19, [#allocation4]  }
 0x1e7   :  { %152 = dma.done.wait [#allocation4], 256  }
 0x1e8   :  { %153 = vsyncadd [#allocation4], 4294967040 }
 0x1e9   :  { %90 = vsyncpa [#allocation3], 1 }
 0x1ea   :  { %91 = vsyncpa [#allocation4], 1 }

</bundles_post_ra>
